<compile_context>
chip_gen: v6e
topology: v6e:2x2x1
jax: 0.10.0
libtpu: 0.0.40
codegen_flags: <defaults>
</compile_context>

<pallas_src>
import jax
import jax.numpy as jnp
from jax.experimental import pallas as pl
from jax.experimental.pallas import tpu as pltpu

_LANES = 128
_MAX_TILE_ROWS = 4096  # 4096*128*4B = 2 MiB per f32 block


def _mish_kernel(x_ref, o_ref):
    x = x_ref[...]
    xf = x.astype(jnp.float32)
    # mish(x) = x * tanh(softplus(x)).  With t = e^x and p = t*(t+2):
    #   tanh(log1p(t)) = ((1+t)^2 - 1) / ((1+t)^2 + 1) = p / (p + 2)
    # PyTorch softplus threshold (beta=1, threshold=20): for x > 20,
    # softplus(x) ~= x and tanh(softplus(x)) == 1 to f32 precision -> y = x.
    t = jnp.exp(jnp.minimum(xf, 20.0))
    p = t * (t + 2.0)
    y = jnp.where(xf > 20.0, xf, xf * (p / (p + 2.0)))
    o_ref[...] = y.astype(o_ref.dtype)


def mish(x):
    orig_shape = x.shape
    orig_dtype = x.dtype
    n = x.size

    xf = jnp.ravel(x)
    # Pad only when the flat length is not 128-aligned (avoids an extra HBM
    # pass in the common aligned case, including the test shape).
    n_aligned = pl.cdiv(n, _LANES) * _LANES
    padded = n_aligned != n
    if padded:
        xf = jnp.pad(xf, (0, n_aligned - n))
    rows = n_aligned // _LANES

    # Big lane-dense blocks; a ragged last block is handled by Pallas masking
    # (grid = cdiv), so no padding to a multiple of the tile is needed.
    tile_rows = min(_MAX_TILE_ROWS, pl.cdiv(rows, 8) * 8)
    grid = (pl.cdiv(rows, tile_rows),)

    itemsize = jnp.dtype(orig_dtype).itemsize
    cost = pl.CostEstimate(
        flops=5 * n,
        transcendentals=n,                 # one exp per element
        bytes_accessed=2 * n * itemsize,   # one read + one write
    )

    out = pl.pallas_call(
        _mish_kernel,
        out_shape=jax.ShapeDtypeStruct((rows, _LANES), orig_dtype),
        grid_spec=pl.GridSpec(
            grid=grid,
            in_specs=[pl.BlockSpec((tile_rows, _LANES), lambda i: (i, 0))],
            out_specs=pl.BlockSpec((tile_rows, _LANES), lambda i: (i, 0)),
        ),
        compiler_params=pltpu.CompilerParams(
            dimension_semantics=("parallel",)),
        cost_estimate=cost,
    )(xf.reshape(rows, _LANES))

    if padded:
        return out.reshape(-1)[:n].reshape(orig_shape)
    return out.reshape(orig_shape)


def _mish_ref(x):
    # Reference: numerically-stable softplus + tanh (matches PyTorch).
    xf = x.astype(jnp.float32)
    sp = jnp.where(xf > 20.0, xf, jnp.log1p(jnp.exp(jnp.minimum(xf, 20.0))))
    return (xf * jnp.tanh(sp)).astype(x.dtype)


if __name__ == "__main__":
    key = jax.random.PRNGKey(0)
    x = jax.random.normal(key, (2, 4, 16, 16), dtype=jnp.float32)  # NCHW

    y = mish(x)
    jax.block_until_ready(y)

    y_ref = _mish_ref(x)
    assert y.shape == x.shape and y.dtype == x.dtype
    assert jnp.allclose(y, y_ref, atol=1e-6, rtol=1e-5)
    print("KERNEL_OK")
</pallas_src>

<mosaic_0001>
module attributes {stable_mosaic.version = 11 : i64} {
  func.func @_mish_kernel(%arg0: i32, %arg1: memref<16x128xf32, #tpu.memory_space<vmem>>, %arg2: memref<16x128xf32, #tpu.memory_space<vmem>>) attributes {dimension_semantics = [#tpu.dimension_semantics<parallel>], iteration_bounds = array<i64: 1>, scalar_prefetch = 0 : i64, scratch_operands = 0 : i64, tpu.core_type = #tpu.core_type<tc>, window_params = [{transform_indices = @transform_0, window_bounds = array<i64: 16, 128>}, {transform_indices = @transform_1, window_bounds = array<i64: 16, 128>}]} {
    %c0 = arith.constant 0 : index
    %c0_0 = arith.constant 0 : index
    %0 = vector.load %arg1[%c0, %c0_0] : memref<16x128xf32, #tpu.memory_space<vmem>>, vector<16x128xf32>
    %cst = arith.constant 2.000000e+01 : f32
    %1 = vector.broadcast %cst : f32 to vector<16x128xf32>
    %2 = arith.minimumf %0, %1 : vector<16x128xf32>
    %3 = math.exp %2 : vector<16x128xf32>
    %cst_1 = arith.constant 2.000000e+00 : f32
    %4 = vector.broadcast %cst_1 : f32 to vector<16x128xf32>
    %5 = arith.addf %3, %4 : vector<16x128xf32>
    %6 = arith.mulf %3, %5 : vector<16x128xf32>
    %cst_2 = arith.constant 2.000000e+01 : f32
    %7 = vector.broadcast %cst_2 : f32 to vector<16x128xf32>
    %8 = arith.cmpf ogt, %0, %7 : vector<16x128xf32>
    %cst_3 = arith.constant 2.000000e+00 : f32
    %9 = vector.broadcast %cst_3 : f32 to vector<16x128xf32>
    %10 = arith.addf %6, %9 : vector<16x128xf32>
    %11 = arith.divf %6, %10 : vector<16x128xf32>
    %12 = arith.mulf %0, %11 : vector<16x128xf32>
    %13 = arith.select %8, %0, %12 : vector<16x128xi1>, vector<16x128xf32>
    %c0_4 = arith.constant 0 : index
    %c0_5 = arith.constant 0 : index
    %14 = vector.load %arg2[%c0_4, %c0_5] : memref<16x128xf32, #tpu.memory_space<vmem>>, vector<16x128xf32>
    tpu.vector_store %arg2[%c0_4, %c0_5], %13 {strides = array<i32>} : memref<16x128xf32, #tpu.memory_space<vmem>>, vector<16x128xf32>,
    return
  }
  func.func @transform_0(%arg0: i32) -> (i32, i32) {
    %c0_i32 = arith.constant 0 : i32
    %c0_i32_0 = arith.constant 0 : i32
    return %arg0, %c0_i32 : i32, i32
  }
  func.func @transform_1(%arg0: i32) -> (i32, i32) {
    %c0_i32 = arith.constant 0 : i32
    %c0_i32_0 = arith.constant 0 : i32
    return %arg0, %c0_i32 : i32, i32
  }
}

</mosaic_0001>

<bundles_post_ra>
// kernel: tpu_custom_call.1
= control target key start
LH: loop header
LB: loop body
LE: loop exit
PB: predicated region body
PF: predicated region fallthrough
CT: control target
= control target key end

     0   :  { %6 = vsyncpa [#allocation3], 0  ;;  %s148_s0 = inlined_call_operand.hbm [shape: f32[16,128], index: 0, kind: input, shape index: {}]   ;;  %s149_s1 = inlined_call_operand.hbm [shape: f32[16,128], index: 1, kind: output, shape index: {}]  }
   0x1   :  { %7 = vsyncpa [#allocation4], 0  ;;  %s122_s6 = smov [#allocation2]  }
   0x2   :  { %s13_s7 = sshll.u32 %s122_s6, 4  ;;  %s14_s7 = int_to_ptr.vmem [resolvable:$true] %s13_s7 }
   0x3   :  { %s86_s8 = scalar_lea.vmem %s14_s7, 256  ;;  %p91_p1 = scmp.lt.s32.totalorder %s14_s7, %s14_s7 }
   0x4   :  { %p87_p0 = scmp.ne.s32.totalorder %s14_s7, %s86_s8  ;;  %p92_p2 = scmp.lt.s32.totalorder %s86_s8, %s86_s8 }
   0x6   :  { %p93_p3 = por %p92_p2, %p91_p1 }
   0x8   :  { %p94_p4 = pnand %p93_p3, %p87_p0 }
   0xa   :  { %97 = shalt.err (!%p94_p4)
}
   0xb   :  { %s123_s9 = smov 128   ;;  %s124_s10 = smov 8  }
   0xc   :  { %19 = dma.hbm_to_vmem [thread:$0]  %s148_s0, 256, %s14_s7, [#allocation3], %s123_s9, %s123_s9, %s124_s10  }
   0xd   :  { %118 = dma.done.wait [#allocation3], 256  }
   0xe   :  { %119 = vsyncadd [#allocation3], 4294967040  ;;  %v23_v0 = vld [vmem:[#allocation2] sm:$0xff]  ;;  %v24_v1 = vld [vmem:[#allocation2 + $0x8] sm:$0xff]  ;;  %s125_s0 = smov [#allocation5]  }
   0xf   :  { %v25_v2 = vmin.f32 %v23_v0, 20.0  ;;  %v26_v3 = vmin.f32 %v24_v1, 20.0  ;;  %vm35_vm0 = vcmp.gt.f32.partialorder %v23_v0, 20.0  ;;  %s54_s13 = sshll.u32 %s125_s0, 4  ;;  %vm36_vm1 = vcmp.gt.f32.partialorder %v24_v1, 20.0  ;;  %s55_s13 = int_to_ptr.vmem [resolvable:$true] %s54_s13 }
  0x10   :  { %s98_s14 = scalar_lea.vmem %s55_s13, 256  ;;  %p103_p6 = scmp.lt.s32.totalorder %s55_s13, %s55_s13 }
  0x11   :  { %v27_v4 = vmul.f32 1.442695, %v25_v2  ;;  %v29_v5 = vmul.f32 1.442695, %v26_v3  ;;  %p99_p5 = scmp.ne.s32.totalorder %s55_s13, %s98_s14  ;;  %p104_p7 = scmp.lt.s32.totalorder %s98_s14, %s98_s14 }
  0x13   :  { %70 = vpow2.f32 %v27_v4  ;;  %p105_p8 = por %p104_p7, %p103_p6 }
  0x14   :  { %72 = vpow2.f32 %v29_v5 }
  0x15   :  { %p106_p9 = pnand %p105_p8, %p99_p5 }
  0x20   :  { %v71_v6 = vpop.eup %70 }
  0x21   :  { %v73_v7 = vpop.eup %72  ;;  %v31_v8 = vadd.f32 2.0, %v71_v6 }
  0x22   :  { %v32_v9 = vadd.f32 2.0, %v73_v7 }
  0x23   :  { %v33_v10 = vmul.f32 %v71_v6, %v31_v8 }
  0x24   :  { %v34_v11 = vmul.f32 %v73_v7, %v32_v9 }
  0x25   :  { %v37_v12 = vadd.f32 2.0, %v33_v10 }
  0x26   :  { %v38_v13 = vadd.f32 2.0, %v34_v11 }
  0x27   :  { %74 = vrcp.f32 %v37_v12 }
  0x28   :  { %76 = vrcp.f32 %v38_v13 }
  0x34   :  { %v75_v14 = vpop.eup %74 }
  0x35   :  { %v77_v15 = vpop.eup %76  ;;  %v40_v16 = vmul.f32 %v75_v14, %v33_v10 }
  0x36   :  { %v42_v17 = vmul.f32 %v77_v15, %v34_v11 }
  0x37   :  { %v43_v18 = vmul.f32 %v40_v16, %v23_v0 }
  0x38   :  { %v44_v19 = vmul.f32 %v42_v17, %v24_v1 }
  0x39   :  { %v45_v20 = vsel %vm35_vm0, %v23_v0, %v43_v18 }
  0x3a   :  { %47 = vst [vmem:[#allocation5] sm:$0xff] %v45_v20  ;;  %v46_v21 = vsel %vm36_vm1, %v24_v1, %v44_v19 }
  0x3b   :  { %48 = vst [vmem:[#allocation5 + $0x8] sm:$0xff] %v46_v21 }
  0x3c   :  { %109 = shalt.err (!%p106_p9)
}
  0x3d   :  { %60 = dma.vmem_to_hbm [thread:$0]  %s55_s13, 256, %s149_s1, [#allocation4], %s123_s9, %s123_s9, %s124_s10  }
  0x3e   :  { %120 = dma.done.wait [#allocation4], 256  }
  0x3f   :  { %121 = vsyncadd [#allocation4], 4294967040 }
  0x40   :  { %64 = vsyncpa [#allocation3], 1 }
  0x41   :  { %65 = vsyncpa [#allocation4], 1 }

</bundles_post_ra>
